<compile_context>
chip_gen: v5e
topology: v5e:2x2
jax: 0.10.0
libtpu: 0.0.40
codegen_flags: <defaults>
</compile_context>

<pallas_src>
import functools

import jax
import jax.numpy as jnp
from jax import lax
from jax.experimental import pallas as pl
from jax.experimental.pallas import tpu as pltpu


def direction_classifier_kernel(x_ref, w1_ref, b1_ref, w2_ref, b2_ref,
                                w3_ref, b3_ref, o_ref):
    # fc1 + ReLU : contract x's feature axis (D) against w1's input axis.
    #   (64, D) . (tb, D)^T -> (64, tb), f32 accumulate, no XLU transpose.
    h1 = lax.dot_general(
        w1_ref[...], x_ref[...],
        dimension_numbers=(((1,), (1,)), ((), ())),
        preferred_element_type=jnp.float32) + b1_ref[...]
    h1 = jnp.maximum(h1, 0.0)

    # fc2 + ReLU : (32, 64) @ (64, tb) -> (32, tb)
    h2 = jnp.dot(w2_ref[...], h1, preferred_element_type=jnp.float32) + b2_ref[...]
    h2 = jnp.maximum(h2, 0.0)

    # fc3 logits : (4, 32) @ (32, tb) -> (4, tb)
    logits = jnp.dot(w3_ref[...], h2, preferred_element_type=jnp.float32) + b3_ref[...]

    # Softmax over the class axis (sublane axis, length 4); exact normalization.
    m = jnp.max(logits, axis=0, keepdims=True)
    e = jnp.exp(logits - m)
    denom = jnp.sum(e, axis=0, keepdims=True)
    o_ref[...] = (e / denom).astype(o_ref.dtype)


def _round_up(n, m):
    return ((n + m - 1) // m) * m


# Conservative cap on the double-buffered x tile so total VMEM use stays well
# under the 32 MiB scoped default on every generation (incl. v7x's 64 MiB).
_X_VMEM_BUDGET = 12 * 1024 * 1024
# Batches below this run as a single ungridded block (no per-step overhead).
_SINGLE_BLOCK_MAX = 511


def direction_classifier(x, params, *, tb=2048):
    """x: (B, input_size). Returns (B, 4) softmax probabilities (float32)."""
    w1, b1, w2, b2, w3, b3 = params
    B, D = x.shape

    # bf16 fast path: feed x and a matching-dtype w1 straight to the MXU
    # (f32 accumulate).  For f32 x this is a no-op.
    w1 = w1.astype(x.dtype)
    weight_args = (w1, b1, w2, b2, w3, b3)

    if B <= _SINGLE_BLOCK_MAX:
        # Single full-array block: no grid, no padding, no per-step overhead.
        out_t = pl.pallas_call(
            direction_classifier_kernel,
            out_shape=jax.ShapeDtypeStruct((4, B), jnp.float32),
        )(x, *weight_args)
    else:
        # Batch-tiled path, no wrapper-side padding (ragged last block).
        itemsize = jnp.dtype(x.dtype).itemsize
        d_pad = _round_up(D, 128)          # lane padding of the x tile in VMEM

        tb_eff = _round_up(min(tb, 4096), 128)
        # Keep >= 4 grid steps when B allows: both v7x TensorCores busy and
        # the input double-buffer pipeline full.
        tb_eff = min(tb_eff, _round_up(pl.cdiv(B, 4), 128))
        # Respect the VMEM budget for the double-buffered x tile.
        while tb_eff > 128 and 2 * tb_eff * d_pad * itemsize > _X_VMEM_BUDGET:
            tb_eff = _round_up(tb_eff // 2, 128)
        tb_eff = max(tb_eff, 128)

        grid = (pl.cdiv(B, tb_eff),)

        if D >= 1024:
            # Large-D: the per-tile x DMA is multi-100-KiB while the compute
            # is short; deepen buffering so the DMA stays hidden.
            x_spec = pl.BlockSpec((tb_eff, D), lambda i: (i, 0),
                                  pipeline_mode=pl.Buffered(3))
        else:
            x_spec = pl.BlockSpec((tb_eff, D), lambda i: (i, 0))

        out_t = pl.pallas_call(
            direction_classifier_kernel,
            out_shape=jax.ShapeDtypeStruct((4, B), jnp.float32),
            grid=grid,
            in_specs=[
                x_spec,                                        # x: tiled over batch
                pl.BlockSpec(w1.shape, lambda i: (0, 0)),      # weights/biases resident
                pl.BlockSpec(b1.shape, lambda i: (0, 0)),
                pl.BlockSpec(w2.shape, lambda i: (0, 0)),
                pl.BlockSpec(b2.shape, lambda i: (0, 0)),
                pl.BlockSpec(w3.shape, lambda i: (0, 0)),
                pl.BlockSpec(b3.shape, lambda i: (0, 0)),
            ],
            out_specs=pl.BlockSpec((4, tb_eff), lambda i: (0, i)),
            compiler_params=pltpu.CompilerParams(
                dimension_semantics=("parallel",)),
        )(x, *weight_args)

    # Class-major (4, B) slab -> module's (B, 4).  Kept inside the caller's
    # jit so XLA can fuse the transpose into the consumer; callers that can
    # take class-major probabilities should consume the slab directly.
    return out_t.T


def init_params(key, input_size):
    """Deterministic synthetic init mirroring nn.Linear: W (out,in), b (out,1)."""
    ks = jax.random.split(key, 6)

    def lin(kw, kb, fan_in, fan_out):
        bound = 1.0 / jnp.sqrt(fan_in)
        w = jax.random.uniform(kw, (fan_out, fan_in), jnp.float32, -bound, bound)
        b = jax.random.uniform(kb, (fan_out, 1), jnp.float32, -bound, bound)
        return w, b

    w1, b1 = lin(ks[0], ks[1], input_size, 64)
    w2, b2 = lin(ks[2], ks[3], 64, 32)
    w3, b3 = lin(ks[4], ks[5], 32, 4)
    return (w1, b1, w2, b2, w3, b3)


def reference_forward(x, params):
    w1, b1, w2, b2, w3, b3 = params
    xf = x.astype(jnp.float32)
    h = jnp.maximum(xf @ w1.T + b1.T, 0.0)
    h = jnp.maximum(h @ w2.T + b2.T, 0.0)
    logits = h @ w3.T + b3.T
    return jax.nn.softmax(logits, axis=1)


def _check(fwd, x, params, atol, rtol):
    out = jax.block_until_ready(fwd(x, params))
    ref = reference_forward(x, params)
    assert out.shape == ref.shape, (out.shape, ref.shape)
    assert out.dtype == jnp.float32
    assert jnp.allclose(out, ref, atol=atol, rtol=rtol), "mismatch vs reference"
    assert jnp.allclose(jnp.sum(out, axis=1), 1.0, atol=1e-3), "rows must sum to 1"
    return out


if __name__ == "__main__":
    key = jax.random.PRNGKey(0)
    k_x1, k_x2, k_p = jax.random.split(key, 3)

    input_size = 32
    params = init_params(k_p, input_size)

    # jit the whole wrapper so the final (4,B)->(B,4) transpose fuses.
    fwd = jax.jit(functools.partial(direction_classifier))

    # 1) Small batch: single ungridded block (no grid overhead, no padding).
    x_small = jax.random.normal(k_x1, (16, input_size), jnp.float32)
    _check(fwd, x_small, params, atol=2e-3, rtol=2e-3)

    # 2) Non-divisible larger batch: tiled path with a ragged last block
    #    (B=640 -> tb_eff=256, grid=3, last block only half valid), no pad.
    x_tiled = jax.random.normal(k_x2, (640, input_size), jnp.float32)
    _check(fwd, x_tiled, params, atol=2e-3, rtol=2e-3)

    # 3) bf16 input fast path (bf16 x + bf16 w1 into the MXU, f32 accumulate).
    x_bf16 = x_small.astype(jnp.bfloat16)
    _check(fwd, x_bf16, params, atol=3e-2, rtol=3e-2)

    print("KERNEL_OK")
</pallas_src>

<mosaic_0001>
module attributes {stable_mosaic.version = 11 : i64} {
  func.func @direction_classifier_kernel(%arg0: memref<16x32xf32, #tpu.memory_space<vmem>>, %arg1: memref<64x32xf32, #tpu.memory_space<vmem>>, %arg2: memref<64x1xf32, #tpu.memory_space<vmem>>, %arg3: memref<32x64xf32, #tpu.memory_space<vmem>>, %arg4: memref<32x1xf32, #tpu.memory_space<vmem>>, %arg5: memref<4x32xf32, #tpu.memory_space<vmem>>, %arg6: memref<4x1xf32, #tpu.memory_space<vmem>>, %arg7: memref<4x16xf32, #tpu.memory_space<vmem>>) attributes {dimension_semantics = [], scalar_prefetch = 0 : i64, scratch_operands = 0 : i64, tpu.core_type = #tpu.core_type<tc>} {
    %c0 = arith.constant 0 : index
    %c0_0 = arith.constant 0 : index
    %0 = vector.load %arg1[%c0, %c0_0] : memref<64x32xf32, #tpu.memory_space<vmem>>, vector<64x32xf32>
    %c0_1 = arith.constant 0 : index
    %c0_2 = arith.constant 0 : index
    %1 = vector.load %arg0[%c0_1, %c0_2] : memref<16x32xf32, #tpu.memory_space<vmem>>, vector<16x32xf32>
    %cst = arith.constant dense<0.000000e+00> : vector<64x16xf32>
    %2 = tpu.matmul %0, %1, %cst {dimension_numbers = #tpu.dot_dimension_numbers<[1], [1], [0], [0], [0, 0, 1, 0], [], []>} : vector<64x32xf32>, vector<16x32xf32>, vector<64x16xf32> -> vector<64x16xf32>
    %c0_3 = arith.constant 0 : index
    %c0_4 = arith.constant 0 : index
    %3 = vector.load %arg2[%c0_3, %c0_4] : memref<64x1xf32, #tpu.memory_space<vmem>>, vector<64x1xf32>
    %4 = vector.broadcast %3 : vector<64x1xf32> to vector<64x16xf32>
    %5 = arith.addf %2, %4 : vector<64x16xf32>
    %cst_5 = arith.constant 0.000000e+00 : f32
    %6 = vector.broadcast %cst_5 : f32 to vector<64x16xf32>
    %7 = arith.maximumf %5, %6 : vector<64x16xf32>
    %c0_6 = arith.constant 0 : index
    %c0_7 = arith.constant 0 : index
    %8 = vector.load %arg3[%c0_6, %c0_7] : memref<32x64xf32, #tpu.memory_space<vmem>>, vector<32x64xf32>
    %cst_8 = arith.constant dense<0.000000e+00> : vector<32x16xf32>
    %9 = tpu.matmul %8, %7, %cst_8 {dimension_numbers = #tpu.dot_dimension_numbers<[1], [0], [0], [1], [0, 0, 1, 1], [], []>} : vector<32x64xf32>, vector<64x16xf32>, vector<32x16xf32> -> vector<32x16xf32>
    %c0_9 = arith.constant 0 : index
    %c0_10 = arith.constant 0 : index
    %10 = vector.load %arg4[%c0_9, %c0_10] : memref<32x1xf32, #tpu.memory_space<vmem>>, vector<32x1xf32>
    %11 = vector.broadcast %10 : vector<32x1xf32> to vector<32x16xf32>
    %12 = arith.addf %9, %11 : vector<32x16xf32>
    %cst_11 = arith.constant 0.000000e+00 : f32
    %13 = vector.broadcast %cst_11 : f32 to vector<32x16xf32>
    %14 = arith.maximumf %12, %13 : vector<32x16xf32>
    %c0_12 = arith.constant 0 : index
    %c0_13 = arith.constant 0 : index
    %15 = vector.load %arg5[%c0_12, %c0_13] : memref<4x32xf32, #tpu.memory_space<vmem>>, vector<4x32xf32>
    %cst_14 = arith.constant dense<0.000000e+00> : vector<4x16xf32>
    %16 = tpu.matmul %15, %14, %cst_14 {dimension_numbers = #tpu.dot_dimension_numbers<[1], [0], [0], [1], [0, 0, 1, 1], [], []>} : vector<4x32xf32>, vector<32x16xf32>, vector<4x16xf32> -> vector<4x16xf32>
    %c0_15 = arith.constant 0 : index
    %c0_16 = arith.constant 0 : index
    %17 = vector.load %arg6[%c0_15, %c0_16] : memref<4x1xf32, #tpu.memory_space<vmem>>, vector<4x1xf32>
    %18 = vector.broadcast %17 : vector<4x1xf32> to vector<4x16xf32>
    %19 = arith.addf %16, %18 : vector<4x16xf32>
    %cst_17 = arith.constant dense<0xFF800000> : vector<16xf32>
    %20 = vector.multi_reduction <maximumf>, %19, %cst_17 [0] : vector<4x16xf32> to vector<16xf32>
    %21 = vector.shape_cast %20 : vector<16xf32> to vector<1x16xf32>
    %22 = vector.broadcast %21 : vector<1x16xf32> to vector<4x16xf32>
    %23 = arith.subf %19, %22 : vector<4x16xf32>
    %24 = math.exp %23 : vector<4x16xf32>
    %cst_18 = arith.constant dense<0.000000e+00> : vector<16xf32>
    %25 = vector.multi_reduction <add>, %24, %cst_18 [0] : vector<4x16xf32> to vector<16xf32>
    %26 = vector.shape_cast %25 : vector<16xf32> to vector<1x16xf32>
    %27 = vector.broadcast %26 : vector<1x16xf32> to vector<4x16xf32>
    %28 = arith.divf %24, %27 : vector<4x16xf32>
    %c0_19 = arith.constant 0 : index
    %c0_20 = arith.constant 0 : index
    %29 = vector.load %arg7[%c0_19, %c0_20] : memref<4x16xf32, #tpu.memory_space<vmem>>, vector<4x16xf32>
    tpu.vector_store %arg7[%c0_19, %c0_20], %28 {strides = array<i32>} : memref<4x16xf32, #tpu.memory_space<vmem>>, vector<4x16xf32>,
    return
  }
}

</mosaic_0001>

<bundles_post_ra>
// kernel: direction_classifier.1
= control target key start
LH: loop header
LB: loop body
LE: loop exit
PB: predicated region body
PF: predicated region fallthrough
CT: control target
= control target key end

     0   :  { %vm85_vm0 = vcmask 261120   ;;  %v379_v3 = vmov 0   ;;  %s524_s0 = inlined_call_operand.vmem [shape: f32[16,32], index: 0, kind: input, shape index: {}]   ;;  %s525_s1 = inlined_call_operand.vmem [shape: f32[64,32], index: 1, kind: input, shape index: {}]   ;;  %s526_s2 = inlined_call_operand.vmem [shape: f32[64,1], index: 2, kind: input, shape index: {}]   ;;  %s527_s3 = inlined_call_operand.vmem [shape: f32[32,64], index: 3, kind: input, shape index: {}]   ;;  %s528_s4 = inlined_call_operand.vmem [shape: f32[32,1], index: 4, kind: input, shape index: {}]   ;;  %s529_s5 = inlined_call_operand.vmem [shape: f32[4,32], index: 5, kind: input, shape index: {}]   ;;  %s530_s6 = inlined_call_operand.vmem [shape: f32[4,1], index: 6, kind: input, shape index: {}]   ;;  %s531_s7 = inlined_call_operand.hbm [shape: f32[4,16], index: 7, kind: output, shape index: {}]  }
   0x1   :  { %v36_v0 = vld [vmem:[%s524_s0 + $0x8] sm:$0xff]  ;;  %v44_v1 = vld [vmem:[%s526_s2 + $0x38] sm:$0xff]  ;;  %v35_v2 = vld [vmem:[%s524_s0] sm:$0xff]  ;;  %346 = vset.pattern.permute.xlu0 %v379_v3  ;;  %347 = vset.pattern.permute.xlu1 %v379_v3 }
   0x2   :  { %334 = vmatpush.xpose.msk.msra.mxu3 %vm85_vm0, %v36_v0  ;;  %319 = vmatpush.xpose.msk.msra.mxu0 %vm85_vm0, %v36_v0  ;;  %v42_v4 = vld [vmem:[%s526_s2 + $0x28] sm:$0xff]  ;;  %v31_v5 = vld [vmem:[%s525_s1 + $0x20] sm:$0xff]  ;;  %v40_v7 = vld [vmem:[%s526_s2 + $0x18] sm:$0xff] }
   0x3   :  { %82 = vperm.xlu0 %346, %v44_v1   ;;  %72 = vperm.xlu1 %347, %v42_v4   ;;  %v27_v6 = vld [vmem:[%s525_s1] sm:$0xff] }
   0x4   :  { %348 = vset.pattern.permute.xlu2 %v379_v3 }
   0x5   :  { %62 = vperm.xlu2 %348, %v40_v7  }
   0x6   :  { %335 = vmatpush.xpose.msk.msra.mxu3 %vm85_vm0, %v35_v2  ;;  %320 = vmatpush.xpose.msk.msra.mxu0 %vm85_vm0, %v35_v2 }
   0x7   :  { %12 = vsyncpa [#allocation3], 0  ;;  %v43_v8 = vld [vmem:[%s526_s2 + $0x30] sm:$0xff]  ;;  %v41_v9 = vld [vmem:[%s526_s2 + $0x20] sm:$0xff]  ;;  %vm193_vm1 = vcmask 523264   ;;  %vm269_vm2 = vcmask 125952  }
   0x8   :  { %v39_v10 = vld [vmem:[%s526_s2 + $0x10] sm:$0xff]  ;;  %v32_v11 = vld [vmem:[%s525_s1 + $0x28] sm:$0xff]  ;;  %v37_v14 = vld [vmem:[%s526_s2] sm:$0xff]  ;;  %s310_s30 = sshll.u32 %s531_s7, 4  ;;  %s311_s30 = int_to_ptr.hbm [resolvable:$true] %s310_s30 }
   0x9   :  { %325 = vmatmul.msk.f32.vlgmr.msra.gmra.mxu3 %vm85_vm0, %v31_v5  ;;  %321 = vmatmul.msk.f32.vlgmr.msra.gmra.mxu0 %vm85_vm0, %v27_v6  ;;  %v28_v12 = vld [vmem:[%s525_s1 + $0x8] sm:$0xff]  ;;  %v172_v15 = vld [vmem:[%s528_s4 + $0x18] sm:$0xff]  ;;  %v33_v16 = vld [vmem:[%s525_s1 + $0x30] sm:$0xff] }
   0xa   :  { %v38_v13 = vld [vmem:[%s526_s2 + $0x8] sm:$0xff]  ;;  %v29_v17 = vld [vmem:[%s525_s1 + $0x10] sm:$0xff]  ;;  %v169_v20 = vld [vmem:[%s528_s4] sm:$0xff] }
   0xb   :  { %77 = vperm.xlu0 %346, %v43_v8   ;;  %67 = vperm.xlu1 %347, %v41_v9   ;;  %v171_v18 = vld [vmem:[%s528_s4 + $0x10] sm:$0xff]  ;;  %v170_v19 = vld [vmem:[%s528_s4 + $0x8] sm:$0xff]  ;;  %v34_v21 = vld [vmem:[%s525_s1 + $0x38] sm:$0xff] }
   0xc   :  { %v30_v22 = vld [vmem:[%s525_s1 + $0x18] sm:$0xff]  ;;  %v240_v23 = vld [vmem:[%s530_s6] sm:$0xf]  ;;  %v166_v58 = vld [vmem:[%s527_s3 + $0x8] sm:$0xff] }
   0xd   :  { %57 = vperm.xlu2 %348, %v39_v10   ;;  %v165_v56 = vld [vmem:[%s527_s3] sm:$0xff]  ;;  %v168_v57 = vld [vmem:[%s527_s3 + $0x18] sm:$0xff]  ;;  %v167_v59 = vld [vmem:[%s527_s3 + $0x10] sm:$0xff] }
  0x11   :  { %326 = vmatmul.msk.f32.gmra.mxu3 %vm85_vm0, %v32_v11  ;;  %322 = vmatmul.msk.f32.gmra.mxu0 %vm85_vm0, %v28_v12  ;;  %v239_v12 = vld [vmem:[%s529_s5] sm:$0xf]  ;;  %s380_s5 = smov [#allocation2]  }
  0x12   :  { %s308_s27 = sshll.u32 %s380_s5, 4  ;;  %s309_s27 = int_to_ptr.vmem [resolvable:$true] %s308_s27 }
  0x13   :  { %52 = vperm.xlu0 %346, %v38_v13   ;;  %47 = vperm.xlu1 %347, %v37_v14  }
  0x15   :  { %190 = vperm.xlu2 %348, %v172_v15  }
  0x19   :  { %327 = vmatmul.msk.f32.gmra.mxu3 %vm85_vm0, %v33_v16  ;;  %323 = vmatmul.msk.f32.gmra.mxu0 %vm85_vm0, %v29_v17 }
  0x1b   :  { %185 = vperm.xlu0 %346, %v171_v18   ;;  %180 = vperm.xlu1 %347, %v170_v19  }
  0x1d   :  { %175 = vperm.xlu2 %348, %v169_v20  }
  0x21   :  { %328 = vmatmul.msk.f32.gmra.mxu3 %vm85_vm0, %v34_v21  ;;  %324 = vmatmul.msk.f32.gmra.mxu0 %vm85_vm0, %v30_v22 }
  0x23   :  { %243 = vperm.xlu0 %346, %v240_v23  }
  0x5f   :  { %v63_v32 = vpop.permute.xlu2 %62 }
  0x67   :  { %v58_v45 = vpop.permute.xlu2 %57 }
  0x6f   :  { %v191_v61 = vpop.permute.xlu2 %190 }
  0x75   :  { %v83_v28 = vpop.permute.xlu0 %82  ;;  %v73_v29 = vpop.permute.xlu1 %72 }
  0x77   :  { %v176_v7 = vpop.permute.xlu2 %175 }
  0x7d   :  { %v78_v33 = vpop.permute.xlu0 %77  ;;  %v68_v34 = vpop.permute.xlu1 %67 }
  0x85   :  { %v53_v48 = vpop.permute.xlu0 %52  ;;  %v48_v49 = vpop.permute.xlu1 %47 }
  0x86   :  { %v133_v24 = vpop.f32.mrf.mxu0 }
  0x87   :  { %v134_v52 = vadd.f32 %v133_v24, %v48_v49 }
  0x89   :  { %v157_v55 = vmax.f32 %v134_v52, 0.0 }
  0x8c   :  { %v145_v25 = vpop.f32.mrf.mxu3 }
  0x8d   :  { %v146_v41 = vadd.f32 %v145_v25, %v68_v34  ;;  %v186_v2 = vpop.permute.xlu0 %185  ;;  %v181_v3 = vpop.permute.xlu1 %180 }
  0x8e   :  { %v136_v27 = vpop.f32.mrf.mxu0 }
  0x8f   :  { %v161_v46 = vmax.f32 %v146_v41, 0.0  ;;  %v137_v50 = vadd.f32 %v136_v27, %v53_v48 }
  0x91   :  { %v158_v54 = vmax.f32 %v137_v50, 0.0 }
  0x94   :  { %v148_v26 = vpop.f32.mrf.mxu3 }
  0x95   :  { %v149_v38 = vadd.f32 %v148_v26, %v73_v29  ;;  %v244_v13 = vpop.permute.xlu0 %243 }
  0x96   :  { %v139_v31 = vpop.f32.mrf.mxu0 }
  0x97   :  { %v162_v43 = vmax.f32 %v149_v38, 0.0  ;;  %v140_v47 = vadd.f32 %v139_v31, %v58_v45 }
  0x99   :  { %v159_v53 = vmax.f32 %v140_v47, 0.0 }
  0x9c   :  { %v151_v30 = vpop.f32.mrf.mxu3 }
  0x9d   :  { %v152_v36 = vadd.f32 %v151_v30, %v78_v33 }
  0x9e   :  { %v142_v40 = vpop.f32.mrf.mxu0 }
  0x9f   :  { %v163_v42 = vmax.f32 %v152_v36, 0.0  ;;  %v143_v44 = vadd.f32 %v142_v40, %v63_v32 }
  0xa1   :  { %v160_v51 = vmax.f32 %v143_v44, 0.0 }
  0xa4   :  { %v154_v35 = vpop.f32.mrf.mxu3 }
  0xa5   :  { %v155_v37 = vadd.f32 %v154_v35, %v83_v28 }
  0xa7   :  { %v164_v39 = vmax.f32 %v155_v37, 0.0 }
  0xa9   :  { %214 = vmatpush.msra.mxu1 %v164_v39  ;;  %336 = vmatpush.msra.mxu2 %v164_v39 }
  0xab   :  { %215 = vmatpush.msra.mxu1 %v163_v42  ;;  %337 = vmatpush.msra.mxu2 %v163_v42 }
  0xad   :  { %216 = vmatpush.msra.mxu1 %v162_v43  ;;  %338 = vmatpush.msra.mxu2 %v162_v43 }
  0xaf   :  { %217 = vmatpush.msra.mxu1 %v161_v46  ;;  %339 = vmatpush.msra.mxu2 %v161_v46 }
  0xb1   :  { %218 = vmatpush.msra.mxu1 %v160_v51  ;;  %340 = vmatpush.msra.mxu2 %v160_v51 }
  0xb3   :  { %219 = vmatpush.msra.mxu1 %v159_v53  ;;  %341 = vmatpush.msra.mxu2 %v159_v53 }
  0xb5   :  { %220 = vmatpush.msra.mxu1 %v158_v54  ;;  %342 = vmatpush.msra.mxu2 %v158_v54 }
  0xb7   :  { %221 = vmatpush.msra.mxu1 %v157_v55  ;;  %343 = vmatpush.msra.mxu2 %v157_v55 }
  0xb8   :  { %329 = vmatmul.msk.f32.vlgmr.msra.gmra.mxu1 %vm193_vm1, %v165_v56  ;;  %332 = vmatmul.msk.f32.vlgmr.msra.gmra.mxu2 %vm193_vm1, %v168_v57 }
  0xc0   :  { %330 = vmatmul.msk.f32.gmra.mxu1 %vm193_vm1, %v166_v58 }
  0xc8   :  { %331 = vmatmul.msk.f32.gmra.mxu1 %vm193_vm1, %v167_v59 }
 0x135   :  { %v223_v60 = vpop.f32.mrf.mxu1 }
 0x136   :  { %v224_v8 = vadd.f32 %v223_v60, %v176_v7 }
 0x138   :  { %v235_v11 = vmax.f32 %v224_v8, 0.0 }
 0x13b   :  { %v232_v62 = vpop.f32.mrf.mxu2 }
 0x13c   :  { %v233_v63 = vadd.f32 %v232_v62, %v191_v61 }
 0x13d   :  { %v226_v0 = vpop.f32.mrf.mxu1 }
 0x13e   :  { %v238_v1 = vmax.f32 %v233_v63, 0.0  ;;  %v227_v5 = vadd.f32 %v226_v0, %v181_v3 }
 0x140   :  { %261 = vmatpush.msrb.mxu2 %v238_v1  ;;  %v236_v10 = vmax.f32 %v227_v5, 0.0 }
 0x145   :  { %v229_v4 = vpop.f32.mrf.mxu1 }
 0x146   :  { %v230_v6 = vadd.f32 %v229_v4, %v186_v2 }
 0x148   :  { %v237_v9 = vmax.f32 %v230_v6, 0.0 }
 0x14a   :  { %262 = vmatpush.msrb.mxu2 %v237_v9 }
 0x14c   :  { %263 = vmatpush.msrb.mxu2 %v236_v10 }
 0x14e   :  { %264 = vmatpush.msrb.mxu2 %v235_v11 }
 0x14f   :  { %333 = vmatmul.msk.f32.vlgmr.msrb.gmra.mxu2 %vm85_vm0, %v239_v12 }
 0x1d2   :  { %v266_v14 = vpop.f32.mrf.mxu2 }
 0x1d3   :  { %v267_v15 = vadd.f32 %v266_v14, %v244_v13 }
 0x1d5   :  { %v270_v16 = vsel %vm269_vm2, %v267_v15, -inf }
 0x1d6   :  { %v271_v17 = vrot.slane %v270_v16, 4 }
 0x1d8   :  { %v272_v18 = vmax.f32 %v270_v16, %v271_v17 }
 0x1da   :  { %v273_v19 = vrot.slane %v272_v18, 2 }
 0x1dc   :  { %v274_v20 = vmax.f32 %v272_v18, %v273_v19 }
 0x1de   :  { %v275_v21 = vrot.slane %v274_v20, 1 }
 0x1e0   :  { %v276_v22 = vmax.f32 %v274_v20, %v275_v21 }
 0x1e2   :  { %v277_v23 = vsub.f32 %v267_v15, %v276_v22 }
 0x1e4   :  { %v278_v24 = vmul.f32 1.442695, %v277_v23 }
 0x1e6   :  { %349 = vpow2.f32 %v278_v24 }
 0x1ec   :  { %v350_v25 = vpop.eup %349 }
 0x1ed   :  { %v280_v26 = vsel %vm269_vm2, %v350_v25, 0.0 }
 0x1ee   :  { %v281_v27 = vrot.slane %v280_v26, 4 }
 0x1f0   :  { %v282_v28 = vadd.f32 %v281_v27, %v280_v26 }
 0x1f2   :  { %v283_v29 = vrot.slane %v282_v28, 2 }
 0x1f4   :  { %v284_v30 = vadd.f32 %v283_v29, %v282_v28 }
 0x1f6   :  { %v285_v31 = vrot.slane %v284_v30, 1 }
 0x1f8   :  { %v286_v32 = vadd.f32 %v285_v31, %v284_v30 }
 0x1fa   :  { %351 = vrcp.f32 %v286_v32  ;;  %v298_v36 = vand.u32 2147483648, %v286_v32  ;;  %v296_v38 = vand.u32 2147483647, %v286_v32  ;;  %vm292_vm4 = vweird.f32 %v286_v32 }
 0x1fc   :  { %v299_v40 = vor.u32 1.1754944e-38, %v298_v36  ;;  %vm297_vm6 = vcmp.eq.f32.partialorder %v296_v38, 8.507059e+37 }
 0x200   :  { %v352_v33 = vpop.eup %351 }
 0x201   :  { %v288_v34 = vmul.f32 %v352_v33, %v286_v32  ;;  %vm293_vm3 = vweird.f32 %v352_v33 }
 0x202   :  { %vm294_vm5 = vmor %vm292_vm4, %vm293_vm3 }
 0x203   :  { %v289_v35 = vsub.f32 1.0, %v288_v34 }
 0x205   :  { %v290_v37 = vmul.f32 %v352_v33, %v289_v35 }
 0x207   :  { %v291_v39 = vadd.f32 %v352_v33, %v290_v37 }
 0x209   :  { %v295_v41 = vsel %vm294_vm5, %v352_v33, %v291_v39 }
 0x20a   :  { %v300_v42 = vsel %vm297_vm6, %v299_v40, %v295_v41 }
 0x20b   :  { %v301_v43 = vmul.f32 %v350_v25, %v300_v42 }
 0x20d   :  { %302 = vst.msk [vmem:[#allocation2] sm:$0xf] %vm269_vm2, %v301_v43 }
 0x20e   :  { %313 = dma.vmem_to_hbm [thread:$0]  %s309_s27, 64, %s311_s30, [#allocation3]  }
 0x20f   :  { %377 = dma.done.wait [#allocation3], 64  }
 0x210   :  { %378 = vsyncadd [#allocation3], 4294967232 }
 0x211   :  { %318 = vsyncpa [#allocation3], 1 }

</bundles_post_ra>
